<compile_context>
chip_gen: v7x
topology: tpu7x:2x2x1
jax: 0.10.0
libtpu: 0.0.40
codegen_flags: <defaults>
</compile_context>

<pallas_src>
import math

import jax
import jax.numpy as jnp
from jax import lax
from jax.experimental import pallas as pl
from jax.experimental.pallas import tpu as pltpu


def _round_up(x, m):
    return ((x + m - 1) // m) * m


def _vmem_limit_bytes():
    """~75% of physical VMEM (96 MiB v5e/v6e, 48 MiB v7x); safe fallback."""
    try:
        cap = int(getattr(pltpu.get_tpu_info(), "vmem_capacity_bytes", 0))
    except Exception:
        cap = 0
    if cap <= 0:
        cap = 64 * 1024 * 1024
    return int(cap * 3 // 4)


def _make_kernel(B, tb, C, D, use_vpu_gather, gather_dtype):
    def kernel(y_ref, hidden_ref, centers_ref, out_ref):
        i = pl.program_id(0)
        h = hidden_ref[...].astype(jnp.float32)                 # (tb, D) f32
        y = y_ref[...]                                          # (tb, 1) int32

        if use_vpu_gather:
            # Small C: gather centers[y] with a VPU select sweep over classes.
            # No MXU, no (tb, C) iota/one-hot intermediates.
            c = centers_ref[...].astype(jnp.float32)            # (C, D) f32
            c_y = jnp.zeros((tb, D), jnp.float32)
            for k in range(C):
                c_y = jnp.where(y == k, c[k:k + 1, :], c_y)     # (tb, D)
        else:
            # Larger C: one-hot gather on the MXU.
            # (Out-of-range labels contribute a zero center instead of
            #  raising, unlike torch.gather.)
            c = centers_ref[...]
            gdt = c.dtype if gather_dtype is None else gather_dtype
            col = lax.broadcasted_iota(jnp.int32, (tb, C), 1)
            onehot = (col == y).astype(gdt)                     # (tb, C)
            c_y = jnp.dot(onehot, c.astype(gdt),
                          preferred_element_type=jnp.float32)   # (tb, D) f32

        diff = h - c_y
        sq = jnp.sum(diff * diff, axis=1, keepdims=True)        # (tb, 1) f32

        # Mask batch-padding rows (last tile) before reducing.
        row = lax.broadcasted_iota(jnp.int32, (tb, 1), 0) + i * tb
        sq = jnp.where(row < B, sq, 0.0)

        # One lane-dense block per tile holding the tile's partial sum.
        out_ref[...] = jnp.broadcast_to(jnp.sum(sq), (1, 8, 128))

    return kernel


def center_loss_label(y, hidden, centers, lambda_c=1.0, block_b=1024,
                      gather_dtype=None):
    """Pallas TPU implementation of CenterLoss_label.forward(y, hidden)."""
    B, D = hidden.shape
    C, Dc = centers.shape
    assert D == Dc, "hidden and centers feature dims must match"

    in_bytes = jnp.dtype(hidden.dtype).itemsize
    c_bytes = jnp.dtype(centers.dtype).itemsize
    use_vpu_gather = C <= 64

    vmem_limit = _vmem_limit_bytes()
    centers_bytes = C * D * c_bytes                 # single-buffered resident
    budget = max(vmem_limit - centers_bytes - (2 << 20), 4 << 20)

    def tile_bytes(tb):
        b = (2 * tb * D * in_bytes      # hidden tile (double-buffered)
             + 2 * tb * 4               # label tile (double-buffered)
             + 4 * tb * D * 4           # f32 temps: h, c_y, diff, sq
             + 2 * 8 * 128 * 4)         # output block
        if not use_vpu_gather:
            b += tb * C * 8             # iota (i32) + one-hot intermediates
        return b

    # Largest batch tile (multiple of 8) that fits the VMEM budget.
    b8 = _round_up(B, 8)
    tb = max(8, min(_round_up(block_b, 8), b8))
    while tb > 8 and tile_bytes(tb) > budget:
        tb = max(8, (tb // 2 // 8) * 8)

    # Megacore (v7x): guarantee >= 2 grid tiles when the batch can be split,
    # so the "parallel" axis shards across both TensorCores.
    if B >= 16 and _round_up(B, tb) // tb < 2:
        tb = _round_up(math.ceil(B / 2), 8)

    b_pad = _round_up(B, tb)
    num_tiles = b_pad // tb

    y2 = y.astype(jnp.int32).reshape(B, 1)
    h = hidden
    if b_pad != B:
        # Padded rows are masked inside the kernel.
        h = jnp.pad(h, ((0, b_pad - B), (0, 0)))
        y2 = jnp.pad(y2, ((0, b_pad - B), (0, 0)))

    kernel = _make_kernel(B, tb, C, D, use_vpu_gather, gather_dtype)

    def build(centers_spec):
        return pl.pallas_call(
            kernel,
            out_shape=jax.ShapeDtypeStruct((num_tiles, 8, 128), jnp.float32),
            grid_spec=pltpu.PrefetchScalarGridSpec(
                num_scalar_prefetch=0,
                grid=(num_tiles,),
                in_specs=[
                    pl.BlockSpec((tb, 1), lambda i: (i, 0)),    # labels
                    pl.BlockSpec((tb, D), lambda i: (i, 0)),    # hidden tile
                    centers_spec,                               # resident centers
                ],
                out_specs=pl.BlockSpec((1, 8, 128), lambda i: (i, 0, 0)),
            ),
            compiler_params=pltpu.CompilerParams(
                dimension_semantics=("parallel",),
                vmem_limit_bytes=vmem_limit,
            ),
        )

    try:
        out = build(pl.BlockSpec((C, D), lambda i: (0, 0),
                                 pipeline_mode=pl.Buffered(1)))(y2, h, centers)
    except Exception:
        # Fallback: default (double-buffered) centers block if the
        # single-buffer override is rejected by this JAX version.
        out = build(pl.BlockSpec((C, D), lambda i: (0, 0)))(y2, h, centers)

    partials = out[:, 0, 0]                          # (num_tiles,)
    return 0.5 * lambda_c * (jnp.sum(partials) / B)


def _reference(y, hidden, centers, lambda_c=1.0):
    # Pure-JAX mirror of the PyTorch forward (for correctness checking).
    diff = hidden[:, None, :] - centers[None, :, :]          # (B, C, D)
    dist = jnp.sum(diff * diff, axis=-1)                     # (B, C)
    intra = jnp.take_along_axis(dist, y[:, None], axis=1)[:, 0]
    return 0.5 * lambda_c * jnp.mean(intra)


if __name__ == "__main__":
    lambda_c = 1.0
    key = jax.random.PRNGKey(0)

    # Case 1: small class count -> VPU select-gather path, single tile.
    batch, dim_hidden, num_classes = 8, 32, 16
    k_h, k_c, k_y, key = jax.random.split(key, 4)
    hidden = jax.random.normal(k_h, (batch, dim_hidden), dtype=jnp.float32)
    centers = jax.random.normal(k_c, (num_classes, dim_hidden), dtype=jnp.float32)
    y = jax.random.randint(k_y, (batch,), 0, num_classes, dtype=jnp.int32)
    loss = jax.block_until_ready(center_loss_label(y, hidden, centers, lambda_c))
    ref = _reference(y, hidden, centers, lambda_c)
    assert jnp.allclose(loss, ref, rtol=1e-5, atol=1e-5), (loss, ref)

    # Case 2: larger class count -> MXU one-hot path, 2 tiles + padded rows
    # (exercises in-kernel masking and the multi-tile "parallel" axis).
    batch2, dim_hidden2, num_classes2 = 24, 32, 256
    k_h, k_c, k_y, key = jax.random.split(key, 4)
    hidden2 = jax.random.normal(k_h, (batch2, dim_hidden2), dtype=jnp.float32)
    centers2 = jax.random.normal(k_c, (num_classes2, dim_hidden2), dtype=jnp.float32)
    y2 = jax.random.randint(k_y, (batch2,), 0, num_classes2, dtype=jnp.int32)
    loss2 = jax.block_until_ready(center_loss_label(y2, hidden2, centers2, lambda_c))
    ref2 = _reference(y2, hidden2, centers2, lambda_c)
    assert jnp.allclose(loss2, ref2, rtol=1e-5, atol=1e-5), (loss2, ref2)

    print("KERNEL_OK")
</pallas_src>

<mosaic_0001>
module attributes {stable_mosaic.version = 11 : i64} {
  func.func @kernel(%arg0: i32, %arg1: memref<8x1xi32, #tpu.memory_space<vmem>>, %arg2: memref<8x32xf32, #tpu.memory_space<vmem>>, %arg3: memref<16x32xf32, #tpu.memory_space<vmem>>, %arg4: memref<1x8x128xf32, #tpu.memory_space<vmem>>) attributes {dimension_semantics = [#tpu.dimension_semantics<parallel>], iteration_bounds = array<i64: 1>, scalar_prefetch = 0 : i64, scratch_operands = 0 : i64, tpu.core_type = #tpu.core_type<tc>, window_params = [{transform_indices = @transform_0, window_bounds = array<i64: 8, 1>}, {transform_indices = @transform_1, window_bounds = array<i64: 8, 32>}, {pipeline_mode = #tpu.pipeline_mode<synchronous>, transform_indices = @transform_2, window_bounds = array<i64: 16, 32>}, {transform_indices = @transform_3, window_bounds = array<i64: 1, 8, 128>}]} {
    %c0 = arith.constant 0 : index
    %c0_0 = arith.constant 0 : index
    %0 = vector.load %arg2[%c0, %c0_0] : memref<8x32xf32, #tpu.memory_space<vmem>>, vector<8x32xf32>
    %c0_1 = arith.constant 0 : index
    %c0_2 = arith.constant 0 : index
    %1 = vector.load %arg1[%c0_1, %c0_2] : memref<8x1xi32, #tpu.memory_space<vmem>>, vector<8x1xi32>
    %c0_3 = arith.constant 0 : index
    %c0_4 = arith.constant 0 : index
    %2 = vector.load %arg3[%c0_3, %c0_4] : memref<16x32xf32, #tpu.memory_space<vmem>>, vector<16x32xf32>
    %cst = arith.constant 0.000000e+00 : f32
    %3 = vector.broadcast %cst : f32 to vector<8x32xf32>
    %c0_i32 = arith.constant 0 : i32
    %4 = vector.broadcast %c0_i32 : i32 to vector<8x1xi32>
    %5 = arith.cmpi eq, %1, %4 : vector<8x1xi32>
    %6 = vector.extract_strided_slice %2 {offsets = [0, 0], sizes = [1, 32], strides = [1, 1]} : vector<16x32xf32> to vector<1x32xf32>
    %7 = vector.shape_cast %5 : vector<8x1xi1> to vector<8x1xi1>
    %8 = vector.broadcast %7 : vector<8x1xi1> to vector<8x32xi1>
    %9 = vector.shape_cast %6 : vector<1x32xf32> to vector<1x32xf32>
    %10 = vector.broadcast %9 : vector<1x32xf32> to vector<8x32xf32>
    %11 = arith.select %8, %10, %3 : vector<8x32xi1>, vector<8x32xf32>
    %c1_i32 = arith.constant 1 : i32
    %12 = vector.broadcast %c1_i32 : i32 to vector<8x1xi32>
    %13 = arith.cmpi eq, %1, %12 : vector<8x1xi32>
    %14 = vector.extract_strided_slice %2 {offsets = [1, 0], sizes = [1, 32], strides = [1, 1]} : vector<16x32xf32> to vector<1x32xf32>
    %15 = vector.shape_cast %13 : vector<8x1xi1> to vector<8x1xi1>
    %16 = vector.broadcast %15 : vector<8x1xi1> to vector<8x32xi1>
    %17 = vector.shape_cast %14 : vector<1x32xf32> to vector<1x32xf32>
    %18 = vector.broadcast %17 : vector<1x32xf32> to vector<8x32xf32>
    %19 = arith.select %16, %18, %11 : vector<8x32xi1>, vector<8x32xf32>
    %c2_i32 = arith.constant 2 : i32
    %20 = vector.broadcast %c2_i32 : i32 to vector<8x1xi32>
    %21 = arith.cmpi eq, %1, %20 : vector<8x1xi32>
    %22 = vector.extract_strided_slice %2 {offsets = [2, 0], sizes = [1, 32], strides = [1, 1]} : vector<16x32xf32> to vector<1x32xf32>
    %23 = vector.shape_cast %21 : vector<8x1xi1> to vector<8x1xi1>
    %24 = vector.broadcast %23 : vector<8x1xi1> to vector<8x32xi1>
    %25 = vector.shape_cast %22 : vector<1x32xf32> to vector<1x32xf32>
    %26 = vector.broadcast %25 : vector<1x32xf32> to vector<8x32xf32>
    %27 = arith.select %24, %26, %19 : vector<8x32xi1>, vector<8x32xf32>
    %c3_i32 = arith.constant 3 : i32
    %28 = vector.broadcast %c3_i32 : i32 to vector<8x1xi32>
    %29 = arith.cmpi eq, %1, %28 : vector<8x1xi32>
    %30 = vector.extract_strided_slice %2 {offsets = [3, 0], sizes = [1, 32], strides = [1, 1]} : vector<16x32xf32> to vector<1x32xf32>
    %31 = vector.shape_cast %29 : vector<8x1xi1> to vector<8x1xi1>
    %32 = vector.broadcast %31 : vector<8x1xi1> to vector<8x32xi1>
    %33 = vector.shape_cast %30 : vector<1x32xf32> to vector<1x32xf32>
    %34 = vector.broadcast %33 : vector<1x32xf32> to vector<8x32xf32>
    %35 = arith.select %32, %34, %27 : vector<8x32xi1>, vector<8x32xf32>
    %c4_i32 = arith.constant 4 : i32
    %36 = vector.broadcast %c4_i32 : i32 to vector<8x1xi32>
    %37 = arith.cmpi eq, %1, %36 : vector<8x1xi32>
    %38 = vector.extract_strided_slice %2 {offsets = [4, 0], sizes = [1, 32], strides = [1, 1]} : vector<16x32xf32> to vector<1x32xf32>
    %39 = vector.shape_cast %37 : vector<8x1xi1> to vector<8x1xi1>
    %40 = vector.broadcast %39 : vector<8x1xi1> to vector<8x32xi1>
    %41 = vector.shape_cast %38 : vector<1x32xf32> to vector<1x32xf32>
    %42 = vector.broadcast %41 : vector<1x32xf32> to vector<8x32xf32>
    %43 = arith.select %40, %42, %35 : vector<8x32xi1>, vector<8x32xf32>
    %c5_i32 = arith.constant 5 : i32
    %44 = vector.broadcast %c5_i32 : i32 to vector<8x1xi32>
    %45 = arith.cmpi eq, %1, %44 : vector<8x1xi32>
    %46 = vector.extract_strided_slice %2 {offsets = [5, 0], sizes = [1, 32], strides = [1, 1]} : vector<16x32xf32> to vector<1x32xf32>
    %47 = vector.shape_cast %45 : vector<8x1xi1> to vector<8x1xi1>
    %48 = vector.broadcast %47 : vector<8x1xi1> to vector<8x32xi1>
    %49 = vector.shape_cast %46 : vector<1x32xf32> to vector<1x32xf32>
    %50 = vector.broadcast %49 : vector<1x32xf32> to vector<8x32xf32>
    %51 = arith.select %48, %50, %43 : vector<8x32xi1>, vector<8x32xf32>
    %c6_i32 = arith.constant 6 : i32
    %52 = vector.broadcast %c6_i32 : i32 to vector<8x1xi32>
    %53 = arith.cmpi eq, %1, %52 : vector<8x1xi32>
    %54 = vector.extract_strided_slice %2 {offsets = [6, 0], sizes = [1, 32], strides = [1, 1]} : vector<16x32xf32> to vector<1x32xf32>
    %55 = vector.shape_cast %53 : vector<8x1xi1> to vector<8x1xi1>
    %56 = vector.broadcast %55 : vector<8x1xi1> to vector<8x32xi1>
    %57 = vector.shape_cast %54 : vector<1x32xf32> to vector<1x32xf32>
    %58 = vector.broadcast %57 : vector<1x32xf32> to vector<8x32xf32>
    %59 = arith.select %56, %58, %51 : vector<8x32xi1>, vector<8x32xf32>
    %c7_i32 = arith.constant 7 : i32
    %60 = vector.broadcast %c7_i32 : i32 to vector<8x1xi32>
    %61 = arith.cmpi eq, %1, %60 : vector<8x1xi32>
    %62 = vector.extract_strided_slice %2 {offsets = [7, 0], sizes = [1, 32], strides = [1, 1]} : vector<16x32xf32> to vector<1x32xf32>
    %63 = vector.shape_cast %61 : vector<8x1xi1> to vector<8x1xi1>
    %64 = vector.broadcast %63 : vector<8x1xi1> to vector<8x32xi1>
    %65 = vector.shape_cast %62 : vector<1x32xf32> to vector<1x32xf32>
    %66 = vector.broadcast %65 : vector<1x32xf32> to vector<8x32xf32>
    %67 = arith.select %64, %66, %59 : vector<8x32xi1>, vector<8x32xf32>
    %c8_i32 = arith.constant 8 : i32
    %68 = vector.broadcast %c8_i32 : i32 to vector<8x1xi32>
    %69 = arith.cmpi eq, %1, %68 : vector<8x1xi32>
    %70 = vector.extract_strided_slice %2 {offsets = [8, 0], sizes = [1, 32], strides = [1, 1]} : vector<16x32xf32> to vector<1x32xf32>
    %71 = vector.shape_cast %69 : vector<8x1xi1> to vector<8x1xi1>
    %72 = vector.broadcast %71 : vector<8x1xi1> to vector<8x32xi1>
    %73 = vector.shape_cast %70 : vector<1x32xf32> to vector<1x32xf32>
    %74 = vector.broadcast %73 : vector<1x32xf32> to vector<8x32xf32>
    %75 = arith.select %72, %74, %67 : vector<8x32xi1>, vector<8x32xf32>
    %c9_i32 = arith.constant 9 : i32
    %76 = vector.broadcast %c9_i32 : i32 to vector<8x1xi32>
    %77 = arith.cmpi eq, %1, %76 : vector<8x1xi32>
    %78 = vector.extract_strided_slice %2 {offsets = [9, 0], sizes = [1, 32], strides = [1, 1]} : vector<16x32xf32> to vector<1x32xf32>
    %79 = vector.shape_cast %77 : vector<8x1xi1> to vector<8x1xi1>
    %80 = vector.broadcast %79 : vector<8x1xi1> to vector<8x32xi1>
    %81 = vector.shape_cast %78 : vector<1x32xf32> to vector<1x32xf32>
    %82 = vector.broadcast %81 : vector<1x32xf32> to vector<8x32xf32>
    %83 = arith.select %80, %82, %75 : vector<8x32xi1>, vector<8x32xf32>
    %c10_i32 = arith.constant 10 : i32
    %84 = vector.broadcast %c10_i32 : i32 to vector<8x1xi32>
    %85 = arith.cmpi eq, %1, %84 : vector<8x1xi32>
    %86 = vector.extract_strided_slice %2 {offsets = [10, 0], sizes = [1, 32], strides = [1, 1]} : vector<16x32xf32> to vector<1x32xf32>
    %87 = vector.shape_cast %85 : vector<8x1xi1> to vector<8x1xi1>
    %88 = vector.broadcast %87 : vector<8x1xi1> to vector<8x32xi1>
    %89 = vector.shape_cast %86 : vector<1x32xf32> to vector<1x32xf32>
    %90 = vector.broadcast %89 : vector<1x32xf32> to vector<8x32xf32>
    %91 = arith.select %88, %90, %83 : vector<8x32xi1>, vector<8x32xf32>
    %c11_i32 = arith.constant 11 : i32
    %92 = vector.broadcast %c11_i32 : i32 to vector<8x1xi32>
    %93 = arith.cmpi eq, %1, %92 : vector<8x1xi32>
    %94 = vector.extract_strided_slice %2 {offsets = [11, 0], sizes = [1, 32], strides = [1, 1]} : vector<16x32xf32> to vector<1x32xf32>
    %95 = vector.shape_cast %93 : vector<8x1xi1> to vector<8x1xi1>
    %96 = vector.broadcast %95 : vector<8x1xi1> to vector<8x32xi1>
    %97 = vector.shape_cast %94 : vector<1x32xf32> to vector<1x32xf32>
    %98 = vector.broadcast %97 : vector<1x32xf32> to vector<8x32xf32>
    %99 = arith.select %96, %98, %91 : vector<8x32xi1>, vector<8x32xf32>
    %c12_i32 = arith.constant 12 : i32
    %100 = vector.broadcast %c12_i32 : i32 to vector<8x1xi32>
    %101 = arith.cmpi eq, %1, %100 : vector<8x1xi32>
    %102 = vector.extract_strided_slice %2 {offsets = [12, 0], sizes = [1, 32], strides = [1, 1]} : vector<16x32xf32> to vector<1x32xf32>
    %103 = vector.shape_cast %101 : vector<8x1xi1> to vector<8x1xi1>
    %104 = vector.broadcast %103 : vector<8x1xi1> to vector<8x32xi1>
    %105 = vector.shape_cast %102 : vector<1x32xf32> to vector<1x32xf32>
    %106 = vector.broadcast %105 : vector<1x32xf32> to vector<8x32xf32>
    %107 = arith.select %104, %106, %99 : vector<8x32xi1>, vector<8x32xf32>
    %c13_i32 = arith.constant 13 : i32
    %108 = vector.broadcast %c13_i32 : i32 to vector<8x1xi32>
    %109 = arith.cmpi eq, %1, %108 : vector<8x1xi32>
    %110 = vector.extract_strided_slice %2 {offsets = [13, 0], sizes = [1, 32], strides = [1, 1]} : vector<16x32xf32> to vector<1x32xf32>
    %111 = vector.shape_cast %109 : vector<8x1xi1> to vector<8x1xi1>
    %112 = vector.broadcast %111 : vector<8x1xi1> to vector<8x32xi1>
    %113 = vector.shape_cast %110 : vector<1x32xf32> to vector<1x32xf32>
    %114 = vector.broadcast %113 : vector<1x32xf32> to vector<8x32xf32>
    %115 = arith.select %112, %114, %107 : vector<8x32xi1>, vector<8x32xf32>
    %c14_i32 = arith.constant 14 : i32
    %116 = vector.broadcast %c14_i32 : i32 to vector<8x1xi32>
    %117 = arith.cmpi eq, %1, %116 : vector<8x1xi32>
    %118 = vector.extract_strided_slice %2 {offsets = [14, 0], sizes = [1, 32], strides = [1, 1]} : vector<16x32xf32> to vector<1x32xf32>
    %119 = vector.shape_cast %117 : vector<8x1xi1> to vector<8x1xi1>
    %120 = vector.broadcast %119 : vector<8x1xi1> to vector<8x32xi1>
    %121 = vector.shape_cast %118 : vector<1x32xf32> to vector<1x32xf32>
    %122 = vector.broadcast %121 : vector<1x32xf32> to vector<8x32xf32>
    %123 = arith.select %120, %122, %115 : vector<8x32xi1>, vector<8x32xf32>
    %c15_i32 = arith.constant 15 : i32
    %124 = vector.broadcast %c15_i32 : i32 to vector<8x1xi32>
    %125 = arith.cmpi eq, %1, %124 : vector<8x1xi32>
    %126 = vector.extract_strided_slice %2 {offsets = [15, 0], sizes = [1, 32], strides = [1, 1]} : vector<16x32xf32> to vector<1x32xf32>
    %127 = vector.shape_cast %125 : vector<8x1xi1> to vector<8x1xi1>
    %128 = vector.broadcast %127 : vector<8x1xi1> to vector<8x32xi1>
    %129 = vector.shape_cast %126 : vector<1x32xf32> to vector<1x32xf32>
    %130 = vector.broadcast %129 : vector<1x32xf32> to vector<8x32xf32>
    %131 = arith.select %128, %130, %123 : vector<8x32xi1>, vector<8x32xf32>
    %132 = arith.subf %0, %131 : vector<8x32xf32>
    %133 = arith.mulf %132, %132 : vector<8x32xf32>
    %cst_5 = arith.constant dense<0.000000e+00> : vector<8xf32>
    %134 = vector.multi_reduction <add>, %133, %cst_5 [1] : vector<8x32xf32> to vector<8xf32>
    %135 = vector.shape_cast %134 : vector<8xf32> to vector<8x1xf32>
    %136 = tpu.iota {dimensions = array<i32: 0>} : vector<8x1xi32>
    %c8_i32_6 = arith.constant 8 : i32
    %137 = arith.muli %arg0, %c8_i32_6 : i32
    %138 = vector.broadcast %137 : i32 to vector<8x1xi32>
    %139 = arith.addi %136, %138 : vector<8x1xi32>
    %c8_i32_7 = arith.constant 8 : i32
    %140 = vector.broadcast %c8_i32_7 : i32 to vector<8x1xi32>
    %141 = arith.cmpi slt, %139, %140 : vector<8x1xi32>
    %cst_8 = arith.constant 0.000000e+00 : f32
    %142 = vector.broadcast %cst_8 : f32 to vector<8x1xf32>
    %143 = arith.select %141, %135, %142 : vector<8x1xi1>, vector<8x1xf32>
    %144 = vector.shape_cast %143 : vector<8x1xf32> to vector<1x8x1xf32>
    %cst_9 = arith.constant dense<0.000000e+00> : vector<1xf32>
    %145 = vector.multi_reduction <add>, %144, %cst_9 [1, 2] : vector<1x8x1xf32> to vector<1xf32>
    %146 = vector.shape_cast %145 : vector<1xf32> to vector<1x1x1xf32>
    %147 = vector.extract %146[0, 0, 0] : f32 from vector<1x1x1xf32>
    %148 = vector.broadcast %147 : f32 to vector<1x8x128xf32>
    %c0_10 = arith.constant 0 : index
    %c0_11 = arith.constant 0 : index
    %c0_12 = arith.constant 0 : index
    %149 = vector.load %arg4[%c0_10, %c0_11, %c0_12] : memref<1x8x128xf32, #tpu.memory_space<vmem>>, vector<1x8x128xf32>
    tpu.vector_store %arg4[%c0_10, %c0_11, %c0_12], %148 {strides = array<i32>} : memref<1x8x128xf32, #tpu.memory_space<vmem>>, vector<1x8x128xf32>,
    return
  }
  func.func @transform_0(%arg0: i32) -> (i32, i32) {
    %c0_i32 = arith.constant 0 : i32
    %c0_i32_0 = arith.constant 0 : i32
    return %arg0, %c0_i32 : i32, i32
  }
  func.func @transform_1(%arg0: i32) -> (i32, i32) {
    %c0_i32 = arith.constant 0 : i32
    %c0_i32_0 = arith.constant 0 : i32
    return %arg0, %c0_i32 : i32, i32
  }
  func.func @transform_2(%arg0: i32) -> (i32, i32) {
    %c0_i32 = arith.constant 0 : i32
    %c0_i32_0 = arith.constant 0 : i32
    %c0_i32_1 = arith.constant 0 : i32
    return %c0_i32, %c0_i32_0 : i32, i32
  }
  func.func @transform_3(%arg0: i32) -> (i32, i32, i32) {
    %c0_i32 = arith.constant 0 : i32
    %c0_i32_0 = arith.constant 0 : i32
    %c0_i32_1 = arith.constant 0 : i32
    return %arg0, %c0_i32, %c0_i32_0 : i32, i32, i32
  }
}

module attributes {stable_mosaic.version = 11 : i64} {
  func.func @kernel(%arg0: i32, %arg1: memref<8x1xi32, #tpu.memory_space<vmem>>, %arg2: memref<8x32xf32, #tpu.memory_space<vmem>>, %arg3: memref<16x32xf32, #tpu.memory_space<vmem>>, %arg4: memref<1x8x128xf32, #tpu.memory_space<vmem>>) attributes {dimension_semantics = [#tpu.dimension_semantics<parallel>], iteration_bounds = array<i64: 1>, scalar_prefetch = 0 : i64, scratch_operands = 0 : i64, tpu.core_type = #tpu.core_type<tc>, window_params = [{transform_indices = @transform_0, window_bounds = array<i64: 8, 1>}, {transform_indices = @transform_1, window_bounds = array<i64: 8, 32>}, {pipeline_mode = #tpu.pipeline_mode<synchronous>, transform_indices = @transform_2, window_bounds = array<i64: 16, 32>}, {transform_indices = @transform_3, window_bounds = array<i64: 1, 8, 128>}]} {
    %c0 = arith.constant 0 : index
    %c0_0 = arith.constant 0 : index
    %0 = vector.load %arg2[%c0, %c0_0] : memref<8x32xf32, #tpu.memory_space<vmem>>, vector<8x32xf32>
    %c0_1 = arith.constant 0 : index
    %c0_2 = arith.constant 0 : index
    %1 = vector.load %arg1[%c0_1, %c0_2] : memref<8x1xi32, #tpu.memory_space<vmem>>, vector<8x1xi32>
    %c0_3 = arith.constant 0 : index
    %c0_4 = arith.constant 0 : index
    %2 = vector.load %arg3[%c0_3, %c0_4] : memref<16x32xf32, #tpu.memory_space<vmem>>, vector<16x32xf32>
    %cst = arith.constant 0.000000e+00 : f32
    %3 = vector.broadcast %cst : f32 to vector<8x32xf32>
    %c0_i32 = arith.constant 0 : i32
    %4 = vector.broadcast %c0_i32 : i32 to vector<8x1xi32>
    %5 = arith.cmpi eq, %1, %4 : vector<8x1xi32>
    %6 = vector.extract_strided_slice %2 {offsets = [0, 0], sizes = [1, 32], strides = [1, 1]} : vector<16x32xf32> to vector<1x32xf32>
    %7 = vector.shape_cast %5 : vector<8x1xi1> to vector<8x1xi1>
    %8 = vector.broadcast %7 : vector<8x1xi1> to vector<8x32xi1>
    %9 = vector.shape_cast %6 : vector<1x32xf32> to vector<1x32xf32>
    %10 = vector.broadcast %9 : vector<1x32xf32> to vector<8x32xf32>
    %11 = arith.select %8, %10, %3 : vector<8x32xi1>, vector<8x32xf32>
    %c1_i32 = arith.constant 1 : i32
    %12 = vector.broadcast %c1_i32 : i32 to vector<8x1xi32>
    %13 = arith.cmpi eq, %1, %12 : vector<8x1xi32>
    %14 = vector.extract_strided_slice %2 {offsets = [1, 0], sizes = [1, 32], strides = [1, 1]} : vector<16x32xf32> to vector<1x32xf32>
    %15 = vector.shape_cast %13 : vector<8x1xi1> to vector<8x1xi1>
    %16 = vector.broadcast %15 : vector<8x1xi1> to vector<8x32xi1>
    %17 = vector.shape_cast %14 : vector<1x32xf32> to vector<1x32xf32>
    %18 = vector.broadcast %17 : vector<1x32xf32> to vector<8x32xf32>
    %19 = arith.select %16, %18, %11 : vector<8x32xi1>, vector<8x32xf32>
    %c2_i32 = arith.constant 2 : i32
    %20 = vector.broadcast %c2_i32 : i32 to vector<8x1xi32>
    %21 = arith.cmpi eq, %1, %20 : vector<8x1xi32>
    %22 = vector.extract_strided_slice %2 {offsets = [2, 0], sizes = [1, 32], strides = [1, 1]} : vector<16x32xf32> to vector<1x32xf32>
    %23 = vector.shape_cast %21 : vector<8x1xi1> to vector<8x1xi1>
    %24 = vector.broadcast %23 : vector<8x1xi1> to vector<8x32xi1>
    %25 = vector.shape_cast %22 : vector<1x32xf32> to vector<1x32xf32>
    %26 = vector.broadcast %25 : vector<1x32xf32> to vector<8x32xf32>
    %27 = arith.select %24, %26, %19 : vector<8x32xi1>, vector<8x32xf32>
    %c3_i32 = arith.constant 3 : i32
    %28 = vector.broadcast %c3_i32 : i32 to vector<8x1xi32>
    %29 = arith.cmpi eq, %1, %28 : vector<8x1xi32>
    %30 = vector.extract_strided_slice %2 {offsets = [3, 0], sizes = [1, 32], strides = [1, 1]} : vector<16x32xf32> to vector<1x32xf32>
    %31 = vector.shape_cast %29 : vector<8x1xi1> to vector<8x1xi1>
    %32 = vector.broadcast %31 : vector<8x1xi1> to vector<8x32xi1>
    %33 = vector.shape_cast %30 : vector<1x32xf32> to vector<1x32xf32>
    %34 = vector.broadcast %33 : vector<1x32xf32> to vector<8x32xf32>
    %35 = arith.select %32, %34, %27 : vector<8x32xi1>, vector<8x32xf32>
    %c4_i32 = arith.constant 4 : i32
    %36 = vector.broadcast %c4_i32 : i32 to vector<8x1xi32>
    %37 = arith.cmpi eq, %1, %36 : vector<8x1xi32>
    %38 = vector.extract_strided_slice %2 {offsets = [4, 0], sizes = [1, 32], strides = [1, 1]} : vector<16x32xf32> to vector<1x32xf32>
    %39 = vector.shape_cast %37 : vector<8x1xi1> to vector<8x1xi1>
    %40 = vector.broadcast %39 : vector<8x1xi1> to vector<8x32xi1>
    %41 = vector.shape_cast %38 : vector<1x32xf32> to vector<1x32xf32>
    %42 = vector.broadcast %41 : vector<1x32xf32> to vector<8x32xf32>
    %43 = arith.select %40, %42, %35 : vector<8x32xi1>, vector<8x32xf32>
    %c5_i32 = arith.constant 5 : i32
    %44 = vector.broadcast %c5_i32 : i32 to vector<8x1xi32>
    %45 = arith.cmpi eq, %1, %44 : vector<8x1xi32>
    %46 = vector.extract_strided_slice %2 {offsets = [5, 0], sizes = [1, 32], strides = [1, 1]} : vector<16x32xf32> to vector<1x32xf32>
    %47 = vector.shape_cast %45 : vector<8x1xi1> to vector<8x1xi1>
    %48 = vector.broadcast %47 : vector<8x1xi1> to vector<8x32xi1>
    %49 = vector.shape_cast %46 : vector<1x32xf32> to vector<1x32xf32>
    %50 = vector.broadcast %49 : vector<1x32xf32> to vector<8x32xf32>
    %51 = arith.select %48, %50, %43 : vector<8x32xi1>, vector<8x32xf32>
    %c6_i32 = arith.constant 6 : i32
    %52 = vector.broadcast %c6_i32 : i32 to vector<8x1xi32>
    %53 = arith.cmpi eq, %1, %52 : vector<8x1xi32>
    %54 = vector.extract_strided_slice %2 {offsets = [6, 0], sizes = [1, 32], strides = [1, 1]} : vector<16x32xf32> to vector<1x32xf32>
    %55 = vector.shape_cast %53 : vector<8x1xi1> to vector<8x1xi1>
    %56 = vector.broadcast %55 : vector<8x1xi1> to vector<8x32xi1>
    %57 = vector.shape_cast %54 : vector<1x32xf32> to vector<1x32xf32>
    %58 = vector.broadcast %57 : vector<1x32xf32> to vector<8x32xf32>
    %59 = arith.select %56, %58, %51 : vector<8x32xi1>, vector<8x32xf32>
    %c7_i32 = arith.constant 7 : i32
    %60 = vector.broadcast %c7_i32 : i32 to vector<8x1xi32>
    %61 = arith.cmpi eq, %1, %60 : vector<8x1xi32>
    %62 = vector.extract_strided_slice %2 {offsets = [7, 0], sizes = [1, 32], strides = [1, 1]} : vector<16x32xf32> to vector<1x32xf32>
    %63 = vector.shape_cast %61 : vector<8x1xi1> to vector<8x1xi1>
    %64 = vector.broadcast %63 : vector<8x1xi1> to vector<8x32xi1>
    %65 = vector.shape_cast %62 : vector<1x32xf32> to vector<1x32xf32>
    %66 = vector.broadcast %65 : vector<1x32xf32> to vector<8x32xf32>
    %67 = arith.select %64, %66, %59 : vector<8x32xi1>, vector<8x32xf32>
    %c8_i32 = arith.constant 8 : i32
    %68 = vector.broadcast %c8_i32 : i32 to vector<8x1xi32>
    %69 = arith.cmpi eq, %1, %68 : vector<8x1xi32>
    %70 = vector.extract_strided_slice %2 {offsets = [8, 0], sizes = [1, 32], strides = [1, 1]} : vector<16x32xf32> to vector<1x32xf32>
    %71 = vector.shape_cast %69 : vector<8x1xi1> to vector<8x1xi1>
    %72 = vector.broadcast %71 : vector<8x1xi1> to vector<8x32xi1>
    %73 = vector.shape_cast %70 : vector<1x32xf32> to vector<1x32xf32>
    %74 = vector.broadcast %73 : vector<1x32xf32> to vector<8x32xf32>
    %75 = arith.select %72, %74, %67 : vector<8x32xi1>, vector<8x32xf32>
    %c9_i32 = arith.constant 9 : i32
    %76 = vector.broadcast %c9_i32 : i32 to vector<8x1xi32>
    %77 = arith.cmpi eq, %1, %76 : vector<8x1xi32>
    %78 = vector.extract_strided_slice %2 {offsets = [9, 0], sizes = [1, 32], strides = [1, 1]} : vector<16x32xf32> to vector<1x32xf32>
    %79 = vector.shape_cast %77 : vector<8x1xi1> to vector<8x1xi1>
    %80 = vector.broadcast %79 : vector<8x1xi1> to vector<8x32xi1>
    %81 = vector.shape_cast %78 : vector<1x32xf32> to vector<1x32xf32>
    %82 = vector.broadcast %81 : vector<1x32xf32> to vector<8x32xf32>
    %83 = arith.select %80, %82, %75 : vector<8x32xi1>, vector<8x32xf32>
    %c10_i32 = arith.constant 10 : i32
    %84 = vector.broadcast %c10_i32 : i32 to vector<8x1xi32>
    %85 = arith.cmpi eq, %1, %84 : vector<8x1xi32>
    %86 = vector.extract_strided_slice %2 {offsets = [10, 0], sizes = [1, 32], strides = [1, 1]} : vector<16x32xf32> to vector<1x32xf32>
    %87 = vector.shape_cast %85 : vector<8x1xi1> to vector<8x1xi1>
    %88 = vector.broadcast %87 : vector<8x1xi1> to vector<8x32xi1>
    %89 = vector.shape_cast %86 : vector<1x32xf32> to vector<1x32xf32>
    %90 = vector.broadcast %89 : vector<1x32xf32> to vector<8x32xf32>
    %91 = arith.select %88, %90, %83 : vector<8x32xi1>, vector<8x32xf32>
    %c11_i32 = arith.constant 11 : i32
    %92 = vector.broadcast %c11_i32 : i32 to vector<8x1xi32>
    %93 = arith.cmpi eq, %1, %92 : vector<8x1xi32>
    %94 = vector.extract_strided_slice %2 {offsets = [11, 0], sizes = [1, 32], strides = [1, 1]} : vector<16x32xf32> to vector<1x32xf32>
    %95 = vector.shape_cast %93 : vector<8x1xi1> to vector<8x1xi1>
    %96 = vector.broadcast %95 : vector<8x1xi1> to vector<8x32xi1>
    %97 = vector.shape_cast %94 : vector<1x32xf32> to vector<1x32xf32>
    %98 = vector.broadcast %97 : vector<1x32xf32> to vector<8x32xf32>
    %99 = arith.select %96, %98, %91 : vector<8x32xi1>, vector<8x32xf32>
    %c12_i32 = arith.constant 12 : i32
    %100 = vector.broadcast %c12_i32 : i32 to vector<8x1xi32>
    %101 = arith.cmpi eq, %1, %100 : vector<8x1xi32>
    %102 = vector.extract_strided_slice %2 {offsets = [12, 0], sizes = [1, 32], strides = [1, 1]} : vector<16x32xf32> to vector<1x32xf32>
    %103 = vector.shape_cast %101 : vector<8x1xi1> to vector<8x1xi1>
    %104 = vector.broadcast %103 : vector<8x1xi1> to vector<8x32xi1>
    %105 = vector.shape_cast %102 : vector<1x32xf32> to vector<1x32xf32>
    %106 = vector.broadcast %105 : vector<1x32xf32> to vector<8x32xf32>
    %107 = arith.select %104, %106, %99 : vector<8x32xi1>, vector<8x32xf32>
    %c13_i32 = arith.constant 13 : i32
    %108 = vector.broadcast %c13_i32 : i32 to vector<8x1xi32>
    %109 = arith.cmpi eq, %1, %108 : vector<8x1xi32>
    %110 = vector.extract_strided_slice %2 {offsets = [13, 0], sizes = [1, 32], strides = [1, 1]} : vector<16x32xf32> to vector<1x32xf32>
    %111 = vector.shape_cast %109 : vector<8x1xi1> to vector<8x1xi1>
    %112 = vector.broadcast %111 : vector<8x1xi1> to vector<8x32xi1>
    %113 = vector.shape_cast %110 : vector<1x32xf32> to vector<1x32xf32>
    %114 = vector.broadcast %113 : vector<1x32xf32> to vector<8x32xf32>
    %115 = arith.select %112, %114, %107 : vector<8x32xi1>, vector<8x32xf32>
    %c14_i32 = arith.constant 14 : i32
    %116 = vector.broadcast %c14_i32 : i32 to vector<8x1xi32>
    %117 = arith.cmpi eq, %1, %116 : vector<8x1xi32>
    %118 = vector.extract_strided_slice %2 {offsets = [14, 0], sizes = [1, 32], strides = [1, 1]} : vector<16x32xf32> to vector<1x32xf32>
    %119 = vector.shape_cast %117 : vector<8x1xi1> to vector<8x1xi1>
    %120 = vector.broadcast %119 : vector<8x1xi1> to vector<8x32xi1>
    %121 = vector.shape_cast %118 : vector<1x32xf32> to vector<1x32xf32>
    %122 = vector.broadcast %121 : vector<1x32xf32> to vector<8x32xf32>
    %123 = arith.select %120, %122, %115 : vector<8x32xi1>, vector<8x32xf32>
    %c15_i32 = arith.constant 15 : i32
    %124 = vector.broadcast %c15_i32 : i32 to vector<8x1xi32>
    %125 = arith.cmpi eq, %1, %124 : vector<8x1xi32>
    %126 = vector.extract_strided_slice %2 {offsets = [15, 0], sizes = [1, 32], strides = [1, 1]} : vector<16x32xf32> to vector<1x32xf32>
    %127 = vector.shape_cast %125 : vector<8x1xi1> to vector<8x1xi1>
    %128 = vector.broadcast %127 : vector<8x1xi1> to vector<8x32xi1>
    %129 = vector.shape_cast %126 : vector<1x32xf32> to vector<1x32xf32>
    %130 = vector.broadcast %129 : vector<1x32xf32> to vector<8x32xf32>
    %131 = arith.select %128, %130, %123 : vector<8x32xi1>, vector<8x32xf32>
    %132 = arith.subf %0, %131 : vector<8x32xf32>
    %133 = arith.mulf %132, %132 : vector<8x32xf32>
    %cst_5 = arith.constant dense<0.000000e+00> : vector<8xf32>
    %134 = vector.multi_reduction <add>, %133, %cst_5 [1] : vector<8x32xf32> to vector<8xf32>
    %135 = vector.shape_cast %134 : vector<8xf32> to vector<8x1xf32>
    %136 = tpu.iota {dimensions = array<i32: 0>} : vector<8x1xi32>
    %c8_i32_6 = arith.constant 8 : i32
    %137 = arith.muli %arg0, %c8_i32_6 : i32
    %138 = vector.broadcast %137 : i32 to vector<8x1xi32>
    %139 = arith.addi %136, %138 : vector<8x1xi32>
    %c8_i32_7 = arith.constant 8 : i32
    %140 = vector.broadcast %c8_i32_7 : i32 to vector<8x1xi32>
    %141 = arith.cmpi slt, %139, %140 : vector<8x1xi32>
    %cst_8 = arith.constant 0.000000e+00 : f32
    %142 = vector.broadcast %cst_8 : f32 to vector<8x1xf32>
    %143 = arith.select %141, %135, %142 : vector<8x1xi1>, vector<8x1xf32>
    %144 = vector.shape_cast %143 : vector<8x1xf32> to vector<1x8x1xf32>
    %cst_9 = arith.constant dense<0.000000e+00> : vector<1xf32>
    %145 = vector.multi_reduction <add>, %144, %cst_9 [1, 2] : vector<1x8x1xf32> to vector<1xf32>
    %146 = vector.shape_cast %145 : vector<1xf32> to vector<1x1x1xf32>
    %147 = vector.extract %146[0, 0, 0] : f32 from vector<1x1x1xf32>
    %148 = vector.broadcast %147 : f32 to vector<1x8x128xf32>
    %c0_10 = arith.constant 0 : index
    %c0_11 = arith.constant 0 : index
    %c0_12 = arith.constant 0 : index
    %149 = vector.load %arg4[%c0_10, %c0_11, %c0_12] : memref<1x8x128xf32, #tpu.memory_space<vmem>>, vector<1x8x128xf32>
    tpu.vector_store %arg4[%c0_10, %c0_11, %c0_12], %148 {strides = array<i32>} : memref<1x8x128xf32, #tpu.memory_space<vmem>>, vector<1x8x128xf32>,
    return
  }
  func.func @transform_0(%arg0: i32) -> (i32, i32) {
    %c0_i32 = arith.constant 0 : i32
    %c0_i32_0 = arith.constant 0 : i32
    return %arg0, %c0_i32 : i32, i32
  }
  func.func @transform_1(%arg0: i32) -> (i32, i32) {
    %c0_i32 = arith.constant 0 : i32
    %c0_i32_0 = arith.constant 0 : i32
    return %arg0, %c0_i32 : i32, i32
  }
  func.func @transform_2(%arg0: i32) -> (i32, i32) {
    %c0_i32 = arith.constant 0 : i32
    %c0_i32_0 = arith.constant 0 : i32
    %c0_i32_1 = arith.constant 0 : i32
    return %c0_i32, %c0_i32_0 : i32, i32
  }
  func.func @transform_3(%arg0: i32) -> (i32, i32, i32) {
    %c0_i32 = arith.constant 0 : i32
    %c0_i32_0 = arith.constant 0 : i32
    %c0_i32_1 = arith.constant 0 : i32
    return %arg0, %c0_i32, %c0_i32_0 : i32, i32, i32
  }
}

</mosaic_0001>

<bundles_post_ra>
// kernel: tpu_custom_call.1
= control target key start
LH: loop header
LB: loop body
LE: loop exit
PB: predicated region body
PF: predicated region fallthrough
CT: control target
= control target key end

     0   :  { %8 = vsyncpa [#allocation3], 0  ;;  %s369_s0 = inlined_call_operand.vmem [shape: s32[8,1], index: 0, kind: input, shape index: {}]   ;;  %s370_s1 = inlined_call_operand.hbm [shape: f32[8,32], index: 1, kind: input, shape index: {}]   ;;  %s371_s2 = inlined_call_operand.vmem [shape: f32[16,32], index: 2, kind: input, shape index: {}]   ;;  %s372_s3 = inlined_call_operand.hbm [shape: f32[1,8,128], index: 3, kind: output, shape index: {}]  }
   0x1   :  { %9 = vsyncpa [#allocation4], 0  ;;  %s303_s12 = smov [#allocation2]   ;;  %s255_s16 = scalar_lea.hbm %s370_s1, 128 }
   0x2   :  { %s18_s13 = sshll.u32 %s303_s12, 4  ;;  %p256_p0 = scmp.ne.s32.totalorder %s370_s1, %s255_s16  ;;  %s19_s13 = int_to_ptr.vmem [resolvable:$true] %s18_s13 }
   0x3   :  { %p259_p1 = scmp.lt.u32.totalorder %s255_s16, %s370_s1 }
   0x5   :  { %p261_p2 = pnand %p259_p1, %p256_p0 }
   0x7   :  { %264 = shalt.err (!%p261_p2)
}
   0x8   :  { %s265_s21 = scalar_lea.vmem %s19_s13, 128  ;;  %p270_p4 = scmp.lt.s32.totalorder %s19_s13, %s19_s13 }
   0x9   :  { %p266_p3 = scmp.ne.s32.totalorder %s19_s13, %s265_s21  ;;  %p271_p5 = scmp.lt.s32.totalorder %s265_s21, %s265_s21 }
   0xb   :  { %p272_p6 = por %p271_p5, %p270_p4 }
   0xd   :  { %p273_p7 = pnand %p272_p6, %p266_p3 }
   0xf   :  { %276 = shalt.err (!%p273_p7)
}
  0x10   :  { %21 = dma.hbm_to_vmem [thread:$0]  %s370_s1, 128, %s19_s13, [#allocation3]  }
  0x11   :  { %299 = dma.done.wait [#allocation3], 128  }
  0x12   :  { %300 = vsyncadd [#allocation3], 4294967168  ;;  %v304_v0 = vmov 0   ;;  %v28_v1 = vld [vmem:[%s369_s0] sm:$0xff]  ;;  %v37_v18 = vlaneseq  ;;  %v30_v47 = vld [vmem:[%s371_s2 + $0x8] sm:$0xff] }
  0x13   :  { %254 = vset.pattern.permute.xlu1 %v304_v0  ;;  %253 = vset.pattern.permute.xlu0 %v304_v0  ;;  %vm53_vm0 = vcmp.eq.s32.totalorder %v28_v1, 2  ;;  %vm31_vm1 = vcmp.eq.s32.totalorder %v28_v1, 0  ;;  %vm64_vm2 = vcmp.eq.s32.totalorder %v28_v1, 3  ;;  %vm42_vm3 = vcmp.eq.s32.totalorder %v28_v1, 1  ;;  %v29_v21 = vld [vmem:[%s371_s2] sm:$0xff]  ;;  %s305_s2 = smov [#allocation5]  }
  0x14   :  { %v54_v2 = vsel %vm53_vm0, 1, %v304_v0  ;;  %v32_v3 = vsel %vm31_vm1, 1, %v304_v0  ;;  %v65_v4 = vsel %vm64_vm2, 1, %v304_v0  ;;  %v43_v5 = vsel %vm42_vm3, 1, %v304_v0  ;;  %s239_s28 = sshll.u32 %s305_s2, 4  ;;  %s240_s28 = int_to_ptr.vmem [resolvable:$true] %s239_s28 }
  0x15   :  { %56 = vperm.xlu1 %254, %v54_v2   ;;  %34 = vperm.xlu0 %253, %v32_v3   ;;  %vm86_vm4 = vcmp.eq.s32.totalorder %v28_v1, 5  ;;  %vm75_vm5 = vcmp.eq.s32.totalorder %v28_v1, 4  ;;  %vm108_vm6 = vcmp.eq.s32.totalorder %v28_v1, 7  ;;  %vm97_vm7 = vcmp.eq.s32.totalorder %v28_v1, 6  ;;  %s277_s30 = scalar_lea.vmem %s240_s28, 128  ;;  %p282_p9 = scmp.lt.s32.totalorder %s240_s28, %s240_s28 }
  0x16   :  { %v87_v6 = vsel %vm86_vm4, 1, %v304_v0  ;;  %v76_v7 = vsel %vm75_vm5, 1, %v304_v0  ;;  %v109_v8 = vsel %vm108_vm6, 1, %v304_v0  ;;  %v98_v9 = vsel %vm97_vm7, 1, %v304_v0  ;;  %p278_p8 = scmp.ne.s32.totalorder %s240_s28, %s277_s30  ;;  %p283_p10 = scmp.lt.s32.totalorder %s277_s30, %s277_s30 }
  0x17   :  { %vm130_vm8 = vcmp.eq.s32.totalorder %v28_v1, 9  ;;  %vm119_vm9 = vcmp.eq.s32.totalorder %v28_v1, 8  ;;  %vm152_vm10 = vcmp.eq.s32.totalorder %v28_v1, 11  ;;  %vm141_vm11 = vcmp.eq.s32.totalorder %v28_v1, 10 }
  0x18   :  { %v131_v10 = vsel %vm130_vm8, 1, %v304_v0  ;;  %v120_v11 = vsel %vm119_vm9, 1, %v304_v0  ;;  %v153_v12 = vsel %vm152_vm10, 1, %v304_v0  ;;  %v142_v13 = vsel %vm141_vm11, 1, %v304_v0  ;;  %p284_p11 = por %p283_p10, %p282_p9 }
  0x19   :  { %67 = vperm.xlu1 %254, %v65_v4   ;;  %45 = vperm.xlu0 %253, %v43_v5   ;;  %vm174_vm12 = vcmp.eq.s32.totalorder %v28_v1, 13  ;;  %vm163_vm13 = vcmp.eq.s32.totalorder %v28_v1, 12  ;;  %vm196_vm14 = vcmp.eq.s32.totalorder %v28_v1, 15  ;;  %vm185_vm15 = vcmp.eq.s32.totalorder %v28_v1, 14 }
  0x1a   :  { %v175_v14 = vsel %vm174_vm12, 1, %v304_v0  ;;  %v164_v15 = vsel %vm163_vm13, 1, %v304_v0  ;;  %v197_v16 = vsel %vm196_vm14, 1, %v304_v0  ;;  %v186_v17 = vsel %vm185_vm15, 1, %v304_v0  ;;  %p285_p12 = pnand %p284_p11, %p278_p8 }
  0x1b   :  { %v341_v19 = vshrl.u32 %v37_v18, 7 }
  0x1d   :  { %89 = vperm.xlu1 %254, %v87_v6   ;;  %78 = vperm.xlu0 %253, %v76_v7   ;;  %v39_v20 = vsub.s32 0, %v341_v19  ;;  %v50_v22 = vsub.s32 1, %v341_v19  ;;  %v61_v23 = vsub.s32 2, %v341_v19  ;;  %v72_v26 = vsub.s32 3, %v341_v19 }
  0x1e   :  { %v83_v29 = vsub.s32 4, %v341_v19  ;;  %v94_v35 = vsub.s32 5, %v341_v19  ;;  %v105_v38 = vsub.s32 6, %v341_v19  ;;  %v116_v44 = vsub.s32 7, %v341_v19 }
  0x1f   :  { %v40_v27 = vrot.slane %v29_v21, %v39_v20  ;;  %v51_v28 = vrot.slane %v29_v21, %v50_v22  ;;  %v62_v30 = vrot.slane %v29_v21, %v61_v23  ;;  %v73_v33 = vrot.slane %v29_v21, %v72_v26 }
  0x20   :  { %v84_v37 = vrot.slane %v29_v21, %v83_v29  ;;  %v95_v43 = vrot.slane %v29_v21, %v94_v35  ;;  %v106_v46 = vrot.slane %v29_v21, %v105_v38  ;;  %v117_v51 = vrot.slane %v29_v21, %v116_v44 }
  0x21   :  { %111 = vperm.xlu1 %254, %v109_v8   ;;  %100 = vperm.xlu0 %253, %v98_v9   ;;  %v128_v53 = vrot.slane %v30_v47, %v39_v20  ;;  %v139_v57 = vrot.slane %v30_v47, %v50_v22  ;;  %v150_v59 = vrot.slane %v30_v47, %v61_v23 }
  0x22   :  { %v161_v63 = vrot.slane %v30_v47, %v72_v26  ;;  %v172_v1 = vrot.slane %v30_v47, %v83_v29  ;;  %v183_v5 = vrot.slane %v30_v47, %v94_v35  ;;  %v194_v7 = vrot.slane %v30_v47, %v105_v38 }
  0x23   :  { %v205_v8 = vrot.slane %v30_v47, %v116_v44 }
  0x25   :  { %133 = vperm.xlu1 %254, %v131_v10   ;;  %122 = vperm.xlu0 %253, %v120_v11  }
  0x29   :  { %155 = vperm.xlu1 %254, %v153_v12   ;;  %144 = vperm.xlu0 %253, %v142_v13   ;;  %v27_v12 = vld [vmem:[#allocation2] sm:$0xff] }
  0x2d   :  { %177 = vperm.xlu1 %254, %v175_v14   ;;  %166 = vperm.xlu0 %253, %v164_v15  }
  0x31   :  { %199 = vperm.xlu1 %254, %v197_v16   ;;  %188 = vperm.xlu0 %253, %v186_v17  }
  0x94   :  { %v57_v24 = vpop.permute.xlu1 %56  ;;  %v35_v25 = vpop.permute.xlu0 %34 }
  0x95   :  { %vm36_vm0 = vcmp.eq.s32.totalorder %v35_v25, 1  ;;  %vm58_vm2 = vcmp.eq.s32.totalorder %v57_v24, 1 }
  0x96   :  { %v41_v34 = vsel %vm36_vm0, %v40_v27, 0.0  ;;  %vm209_vm0 = vcmask 261120  }
  0x98   :  { %v68_v31 = vpop.permute.xlu1 %67  ;;  %v46_v32 = vpop.permute.xlu0 %45 }
  0x99   :  { %vm47_vm1 = vcmp.eq.s32.totalorder %v46_v32, 1  ;;  %vm69_vm3 = vcmp.eq.s32.totalorder %v68_v31, 1 }
  0x9a   :  { %v52_v36 = vsel %vm47_vm1, %v51_v28, %v41_v34  ;;  %vm220_vm1 = vcmask 7168  }
  0x9b   :  { %v63_v39 = vsel %vm58_vm2, %v62_v30, %v52_v36 }
  0x9c   :  { %v90_v40 = vpop.permute.xlu1 %89  ;;  %v74_v41 = vsel %vm69_vm3, %v73_v33, %v63_v39  ;;  %v79_v42 = vpop.permute.xlu0 %78 }
  0x9d   :  { %vm80_vm4 = vcmp.eq.s32.totalorder %v79_v42, 1  ;;  %vm91_vm5 = vcmp.eq.s32.totalorder %v90_v40, 1 }
  0x9e   :  { %v85_v45 = vsel %vm80_vm4, %v84_v37, %v74_v41 }
  0x9f   :  { %v96_v50 = vsel %vm91_vm5, %v95_v43, %v85_v45 }
  0xa0   :  { %v112_v48 = vpop.permute.xlu1 %111  ;;  %v101_v49 = vpop.permute.xlu0 %100 }
  0xa1   :  { %vm102_vm6 = vcmp.eq.s32.totalorder %v101_v49, 1  ;;  %vm113_vm7 = vcmp.eq.s32.totalorder %v112_v48, 1 }
  0xa2   :  { %v107_v52 = vsel %vm102_vm6, %v106_v46, %v96_v50 }
  0xa3   :  { %v118_v56 = vsel %vm113_vm7, %v117_v51, %v107_v52 }
  0xa4   :  { %v134_v54 = vpop.permute.xlu1 %133  ;;  %v123_v55 = vpop.permute.xlu0 %122 }
  0xa5   :  { %vm124_vm8 = vcmp.eq.s32.totalorder %v123_v55, 1  ;;  %vm135_vm9 = vcmp.eq.s32.totalorder %v134_v54, 1 }
  0xa6   :  { %v129_v58 = vsel %vm124_vm8, %v128_v53, %v118_v56 }
  0xa7   :  { %v140_v62 = vsel %vm135_vm9, %v139_v57, %v129_v58 }
  0xa8   :  { %v156_v60 = vpop.permute.xlu1 %155  ;;  %v145_v61 = vpop.permute.xlu0 %144 }
  0xa9   :  { %vm146_vm10 = vcmp.eq.s32.totalorder %v145_v61, 1  ;;  %vm157_vm11 = vcmp.eq.s32.totalorder %v156_v60, 1 }
  0xaa   :  { %v151_v0 = vsel %vm146_vm10, %v150_v59, %v140_v62 }
  0xab   :  { %v162_v4 = vsel %vm157_vm11, %v161_v63, %v151_v0 }
  0xac   :  { %v178_v2 = vpop.permute.xlu1 %177  ;;  %v167_v3 = vpop.permute.xlu0 %166 }
  0xad   :  { %vm168_vm12 = vcmp.eq.s32.totalorder %v167_v3, 1  ;;  %vm179_vm13 = vcmp.eq.s32.totalorder %v178_v2, 1 }
  0xae   :  { %v173_v6 = vsel %vm168_vm12, %v172_v1, %v162_v4 }
  0xaf   :  { %v184_v11 = vsel %vm179_vm13, %v183_v5, %v173_v6 }
  0xb0   :  { %v200_v9 = vpop.permute.xlu1 %199  ;;  %v189_v10 = vpop.permute.xlu0 %188 }
  0xb1   :  { %vm201_vm14 = vcmp.eq.s32.totalorder %v200_v9, 1  ;;  %vm190_vm15 = vcmp.eq.s32.totalorder %v189_v10, 1 }
  0xb2   :  { %v195_v13 = vsel %vm190_vm15, %v194_v7, %v184_v11 }
  0xb3   :  { %v206_v14 = vsel %vm201_vm14, %v205_v8, %v195_v13 }
  0xb4   :  { %v207_v15 = vsub.f32 %v27_v12, %v206_v14 }
  0xb6   :  { %v208_v16 = vmul.f32 %v207_v15, %v207_v15 }
  0xb8   :  { %v210_v17 = vsel %vm209_vm0, %v208_v16, 0.0 }
  0xb9   :  { %211 = vadd.xlane.f32.xlu0 %v210_v17 }
 0x146   :  { %v212_v18 = vpop.xlane.xlu0 %211 }
 0x147   :  { %v221_v19 = vsel %vm220_vm1, %v212_v18, 0.0 }
 0x148   :  { %222 = vadd.xlane.f32.xlu1 %v221_v19 }
 0x1d5   :  { %v223_v20 = vpop.xlane.xlu1 %222 }
 0x1d6   :  { %v224_v21 = vrot.slane %v223_v20, 4 }
 0x1d8   :  { %v225_v22 = vadd.f32 %v224_v21, %v223_v20 }
 0x1da   :  { %v226_v23 = vrot.slane %v225_v22, 2 }
 0x1dc   :  { %v227_v24 = vadd.f32 %v226_v23, %v225_v22 }
 0x1de   :  { %v228_v25 = vrot.slane %v227_v24, 1 }
 0x1e0   :  { %v229_v26 = vadd.f32 %v228_v25, %v227_v24 }
 0x1e2   :  { %248 = vpush %v229_v26 }
 0x213   :  { %s249_s29 = spop %248 }
 0x214   :  { %v231_v27 = vstv %s249_s29 }
 0x215   :  { %232 = vst [vmem:[#allocation5] sm:$0xff] %v231_v27 }
 0x216   :  { %288 = shalt.err (!%p285_p12)
}
 0x217   :  { %s289_s6 = scalar_lea.hbm %s372_s3, 128 }
 0x218   :  { %p290_p13 = scmp.ne.s32.totalorder %s372_s3, %s289_s6  ;;  %p293_p0 = scmp.lt.u32.totalorder %s289_s6, %s372_s3 }
 0x21a   :  { %p295_p1 = pnand %p293_p0, %p290_p13 }
 0x21c   :  { %298 = shalt.err (!%p295_p1)
}
 0x21d   :  { %242 = dma.vmem_to_hbm [thread:$0]  %s240_s28, 128, %s372_s3, [#allocation4]  }
 0x21e   :  { %301 = dma.done.wait [#allocation4], 128  }
 0x21f   :  { %302 = vsyncadd [#allocation4], 4294967168 }
 0x220   :  { %246 = vsyncpa [#allocation3], 1 }
 0x221   :  { %247 = vsyncpa [#allocation4], 1 }

// kernel: tpu_custom_call.1
= control target key start
LH: loop header
LB: loop body
LE: loop exit
PB: predicated region body
PF: predicated region fallthrough
CT: control target
= control target key end

     0   :  { %8 = vsyncpa [#allocation3], 0  ;;  %s369_s0 = inlined_call_operand.vmem [shape: s32[8,1], index: 0, kind: input, shape index: {}]   ;;  %s370_s1 = inlined_call_operand.hbm [shape: f32[8,32], index: 1, kind: input, shape index: {}]   ;;  %s371_s2 = inlined_call_operand.vmem [shape: f32[16,32], index: 2, kind: input, shape index: {}]   ;;  %s372_s3 = inlined_call_operand.hbm [shape: f32[1,8,128], index: 3, kind: output, shape index: {}]  }
   0x1   :  { %9 = vsyncpa [#allocation4], 0  ;;  %s303_s12 = smov [#allocation2]   ;;  %s255_s16 = scalar_lea.hbm %s370_s1, 128 }
   0x2   :  { %s18_s13 = sshll.u32 %s303_s12, 4  ;;  %p256_p0 = scmp.ne.s32.totalorder %s370_s1, %s255_s16  ;;  %s19_s13 = int_to_ptr.vmem [resolvable:$true] %s18_s13 }
   0x3   :  { %p259_p1 = scmp.lt.u32.totalorder %s255_s16, %s370_s1 }
   0x5   :  { %p261_p2 = pnand %p259_p1, %p256_p0 }
   0x7   :  { %264 = shalt.err (!%p261_p2)
}
   0x8   :  { %s265_s21 = scalar_lea.vmem %s19_s13, 128  ;;  %p270_p4 = scmp.lt.s32.totalorder %s19_s13, %s19_s13 }
   0x9   :  { %p266_p3 = scmp.ne.s32.totalorder %s19_s13, %s265_s21  ;;  %p271_p5 = scmp.lt.s32.totalorder %s265_s21, %s265_s21 }
   0xb   :  { %p272_p6 = por %p271_p5, %p270_p4 }
   0xd   :  { %p273_p7 = pnand %p272_p6, %p266_p3 }
   0xf   :  { %276 = shalt.err (!%p273_p7)
}
  0x10   :  { %21 = dma.hbm_to_vmem [thread:$0]  %s370_s1, 128, %s19_s13, [#allocation3]  }
  0x11   :  { %299 = dma.done.wait [#allocation3], 128  }
  0x12   :  { %300 = vsyncadd [#allocation3], 4294967168  ;;  %v304_v0 = vmov 0   ;;  %v28_v1 = vld [vmem:[%s369_s0] sm:$0xff]  ;;  %v37_v18 = vlaneseq  ;;  %v30_v47 = vld [vmem:[%s371_s2 + $0x8] sm:$0xff] }
  0x13   :  { %254 = vset.pattern.permute.xlu1 %v304_v0  ;;  %253 = vset.pattern.permute.xlu0 %v304_v0  ;;  %vm53_vm0 = vcmp.eq.s32.totalorder %v28_v1, 2  ;;  %vm31_vm1 = vcmp.eq.s32.totalorder %v28_v1, 0  ;;  %vm64_vm2 = vcmp.eq.s32.totalorder %v28_v1, 3  ;;  %vm42_vm3 = vcmp.eq.s32.totalorder %v28_v1, 1  ;;  %v29_v21 = vld [vmem:[%s371_s2] sm:$0xff]  ;;  %s305_s2 = smov [#allocation5]  }
  0x14   :  { %v54_v2 = vsel %vm53_vm0, 1, %v304_v0  ;;  %v32_v3 = vsel %vm31_vm1, 1, %v304_v0  ;;  %v65_v4 = vsel %vm64_vm2, 1, %v304_v0  ;;  %v43_v5 = vsel %vm42_vm3, 1, %v304_v0  ;;  %s239_s28 = sshll.u32 %s305_s2, 4  ;;  %s240_s28 = int_to_ptr.vmem [resolvable:$true] %s239_s28 }
  0x15   :  { %56 = vperm.xlu1 %254, %v54_v2   ;;  %34 = vperm.xlu0 %253, %v32_v3   ;;  %vm86_vm4 = vcmp.eq.s32.totalorder %v28_v1, 5  ;;  %vm75_vm5 = vcmp.eq.s32.totalorder %v28_v1, 4  ;;  %vm108_vm6 = vcmp.eq.s32.totalorder %v28_v1, 7  ;;  %vm97_vm7 = vcmp.eq.s32.totalorder %v28_v1, 6  ;;  %s277_s30 = scalar_lea.vmem %s240_s28, 128  ;;  %p282_p9 = scmp.lt.s32.totalorder %s240_s28, %s240_s28 }
  0x16   :  { %v87_v6 = vsel %vm86_vm4, 1, %v304_v0  ;;  %v76_v7 = vsel %vm75_vm5, 1, %v304_v0  ;;  %v109_v8 = vsel %vm108_vm6, 1, %v304_v0  ;;  %v98_v9 = vsel %vm97_vm7, 1, %v304_v0  ;;  %p278_p8 = scmp.ne.s32.totalorder %s240_s28, %s277_s30  ;;  %p283_p10 = scmp.lt.s32.totalorder %s277_s30, %s277_s30 }
  0x17   :  { %vm130_vm8 = vcmp.eq.s32.totalorder %v28_v1, 9  ;;  %vm119_vm9 = vcmp.eq.s32.totalorder %v28_v1, 8  ;;  %vm152_vm10 = vcmp.eq.s32.totalorder %v28_v1, 11  ;;  %vm141_vm11 = vcmp.eq.s32.totalorder %v28_v1, 10 }
  0x18   :  { %v131_v10 = vsel %vm130_vm8, 1, %v304_v0  ;;  %v120_v11 = vsel %vm119_vm9, 1, %v304_v0  ;;  %v153_v12 = vsel %vm152_vm10, 1, %v304_v0  ;;  %v142_v13 = vsel %vm141_vm11, 1, %v304_v0  ;;  %p284_p11 = por %p283_p10, %p282_p9 }
  0x19   :  { %67 = vperm.xlu1 %254, %v65_v4   ;;  %45 = vperm.xlu0 %253, %v43_v5   ;;  %vm174_vm12 = vcmp.eq.s32.totalorder %v28_v1, 13  ;;  %vm163_vm13 = vcmp.eq.s32.totalorder %v28_v1, 12  ;;  %vm196_vm14 = vcmp.eq.s32.totalorder %v28_v1, 15  ;;  %vm185_vm15 = vcmp.eq.s32.totalorder %v28_v1, 14 }
  0x1a   :  { %v175_v14 = vsel %vm174_vm12, 1, %v304_v0  ;;  %v164_v15 = vsel %vm163_vm13, 1, %v304_v0  ;;  %v197_v16 = vsel %vm196_vm14, 1, %v304_v0  ;;  %v186_v17 = vsel %vm185_vm15, 1, %v304_v0  ;;  %p285_p12 = pnand %p284_p11, %p278_p8 }
  0x1b   :  { %v341_v19 = vshrl.u32 %v37_v18, 7 }
  0x1d   :  { %89 = vperm.xlu1 %254, %v87_v6   ;;  %78 = vperm.xlu0 %253, %v76_v7   ;;  %v39_v20 = vsub.s32 0, %v341_v19  ;;  %v50_v22 = vsub.s32 1, %v341_v19  ;;  %v61_v23 = vsub.s32 2, %v341_v19  ;;  %v72_v26 = vsub.s32 3, %v341_v19 }
  0x1e   :  { %v83_v29 = vsub.s32 4, %v341_v19  ;;  %v94_v35 = vsub.s32 5, %v341_v19  ;;  %v105_v38 = vsub.s32 6, %v341_v19  ;;  %v116_v44 = vsub.s32 7, %v341_v19 }
  0x1f   :  { %v40_v27 = vrot.slane %v29_v21, %v39_v20  ;;  %v51_v28 = vrot.slane %v29_v21, %v50_v22  ;;  %v62_v30 = vrot.slane %v29_v21, %v61_v23  ;;  %v73_v33 = vrot.slane %v29_v21, %v72_v26 }
  0x20   :  { %v84_v37 = vrot.slane %v29_v21, %v83_v29  ;;  %v95_v43 = vrot.slane %v29_v21, %v94_v35  ;;  %v106_v46 = vrot.slane %v29_v21, %v105_v38  ;;  %v117_v51 = vrot.slane %v29_v21, %v116_v44 }
  0x21   :  { %111 = vperm.xlu1 %254, %v109_v8   ;;  %100 = vperm.xlu0 %253, %v98_v9   ;;  %v128_v53 = vrot.slane %v30_v47, %v39_v20  ;;  %v139_v57 = vrot.slane %v30_v47, %v50_v22  ;;  %v150_v59 = vrot.slane %v30_v47, %v61_v23 }
  0x22   :  { %v161_v63 = vrot.slane %v30_v47, %v72_v26  ;;  %v172_v1 = vrot.slane %v30_v47, %v83_v29  ;;  %v183_v5 = vrot.slane %v30_v47, %v94_v35  ;;  %v194_v7 = vrot.slane %v30_v47, %v105_v38 }
  0x23   :  { %v205_v8 = vrot.slane %v30_v47, %v116_v44 }
  0x25   :  { %133 = vperm.xlu1 %254, %v131_v10   ;;  %122 = vperm.xlu0 %253, %v120_v11  }
  0x29   :  { %155 = vperm.xlu1 %254, %v153_v12   ;;  %144 = vperm.xlu0 %253, %v142_v13   ;;  %v27_v12 = vld [vmem:[#allocation2] sm:$0xff] }
  0x2d   :  { %177 = vperm.xlu1 %254, %v175_v14   ;;  %166 = vperm.xlu0 %253, %v164_v15  }
  0x31   :  { %199 = vperm.xlu1 %254, %v197_v16   ;;  %188 = vperm.xlu0 %253, %v186_v17  }
  0x94   :  { %v57_v24 = vpop.permute.xlu1 %56  ;;  %v35_v25 = vpop.permute.xlu0 %34 }
  0x95   :  { %vm36_vm0 = vcmp.eq.s32.totalorder %v35_v25, 1  ;;  %vm58_vm2 = vcmp.eq.s32.totalorder %v57_v24, 1 }
  0x96   :  { %v41_v34 = vsel %vm36_vm0, %v40_v27, 0.0  ;;  %vm209_vm0 = vcmask 261120  }
  0x98   :  { %v68_v31 = vpop.permute.xlu1 %67  ;;  %v46_v32 = vpop.permute.xlu0 %45 }
  0x99   :  { %vm47_vm1 = vcmp.eq.s32.totalorder %v46_v32, 1  ;;  %vm69_vm3 = vcmp.eq.s32.totalorder %v68_v31, 1 }
  0x9a   :  { %v52_v36 = vsel %vm47_vm1, %v51_v28, %v41_v34  ;;  %vm220_vm1 = vcmask 7168  }
  0x9b   :  { %v63_v39 = vsel %vm58_vm2, %v62_v30, %v52_v36 }
  0x9c   :  { %v90_v40 = vpop.permute.xlu1 %89  ;;  %v74_v41 = vsel %vm69_vm3, %v73_v33, %v63_v39  ;;  %v79_v42 = vpop.permute.xlu0 %78 }
  0x9d   :  { %vm80_vm4 = vcmp.eq.s32.totalorder %v79_v42, 1  ;;  %vm91_vm5 = vcmp.eq.s32.totalorder %v90_v40, 1 }
  0x9e   :  { %v85_v45 = vsel %vm80_vm4, %v84_v37, %v74_v41 }
  0x9f   :  { %v96_v50 = vsel %vm91_vm5, %v95_v43, %v85_v45 }
  0xa0   :  { %v112_v48 = vpop.permute.xlu1 %111  ;;  %v101_v49 = vpop.permute.xlu0 %100 }
  0xa1   :  { %vm102_vm6 = vcmp.eq.s32.totalorder %v101_v49, 1  ;;  %vm113_vm7 = vcmp.eq.s32.totalorder %v112_v48, 1 }
  0xa2   :  { %v107_v52 = vsel %vm102_vm6, %v106_v46, %v96_v50 }
  0xa3   :  { %v118_v56 = vsel %vm113_vm7, %v117_v51, %v107_v52 }
  0xa4   :  { %v134_v54 = vpop.permute.xlu1 %133  ;;  %v123_v55 = vpop.permute.xlu0 %122 }
  0xa5   :  { %vm124_vm8 = vcmp.eq.s32.totalorder %v123_v55, 1  ;;  %vm135_vm9 = vcmp.eq.s32.totalorder %v134_v54, 1 }
  0xa6   :  { %v129_v58 = vsel %vm124_vm8, %v128_v53, %v118_v56 }
  0xa7   :  { %v140_v62 = vsel %vm135_vm9, %v139_v57, %v129_v58 }
  0xa8   :  { %v156_v60 = vpop.permute.xlu1 %155  ;;  %v145_v61 = vpop.permute.xlu0 %144 }
  0xa9   :  { %vm146_vm10 = vcmp.eq.s32.totalorder %v145_v61, 1  ;;  %vm157_vm11 = vcmp.eq.s32.totalorder %v156_v60, 1 }
  0xaa   :  { %v151_v0 = vsel %vm146_vm10, %v150_v59, %v140_v62 }
  0xab   :  { %v162_v4 = vsel %vm157_vm11, %v161_v63, %v151_v0 }
  0xac   :  { %v178_v2 = vpop.permute.xlu1 %177  ;;  %v167_v3 = vpop.permute.xlu0 %166 }
  0xad   :  { %vm168_vm12 = vcmp.eq.s32.totalorder %v167_v3, 1  ;;  %vm179_vm13 = vcmp.eq.s32.totalorder %v178_v2, 1 }
  0xae   :  { %v173_v6 = vsel %vm168_vm12, %v172_v1, %v162_v4 }
  0xaf   :  { %v184_v11 = vsel %vm179_vm13, %v183_v5, %v173_v6 }
  0xb0   :  { %v200_v9 = vpop.permute.xlu1 %199  ;;  %v189_v10 = vpop.permute.xlu0 %188 }
  0xb1   :  { %vm201_vm14 = vcmp.eq.s32.totalorder %v200_v9, 1  ;;  %vm190_vm15 = vcmp.eq.s32.totalorder %v189_v10, 1 }
  0xb2   :  { %v195_v13 = vsel %vm190_vm15, %v194_v7, %v184_v11 }
  0xb3   :  { %v206_v14 = vsel %vm201_vm14, %v205_v8, %v195_v13 }
  0xb4   :  { %v207_v15 = vsub.f32 %v27_v12, %v206_v14 }
  0xb6   :  { %v208_v16 = vmul.f32 %v207_v15, %v207_v15 }
  0xb8   :  { %v210_v17 = vsel %vm209_vm0, %v208_v16, 0.0 }
  0xb9   :  { %211 = vadd.xlane.f32.xlu0 %v210_v17 }
 0x146   :  { %v212_v18 = vpop.xlane.xlu0 %211 }
 0x147   :  { %v221_v19 = vsel %vm220_vm1, %v212_v18, 0.0 }
 0x148   :  { %222 = vadd.xlane.f32.xlu1 %v221_v19 }
 0x1d5   :  { %v223_v20 = vpop.xlane.xlu1 %222 }
 0x1d6   :  { %v224_v21 = vrot.slane %v223_v20, 4 }
 0x1d8   :  { %v225_v22 = vadd.f32 %v224_v21, %v223_v20 }
 0x1da   :  { %v226_v23 = vrot.slane %v225_v22, 2 }
 0x1dc   :  { %v227_v24 = vadd.f32 %v226_v23, %v225_v22 }
 0x1de   :  { %v228_v25 = vrot.slane %v227_v24, 1 }
 0x1e0   :  { %v229_v26 = vadd.f32 %v228_v25, %v227_v24 }
 0x1e2   :  { %248 = vpush %v229_v26 }
 0x213   :  { %s249_s29 = spop %248 }
 0x214   :  { %v231_v27 = vstv %s249_s29 }
 0x215   :  { %232 = vst [vmem:[#allocation5] sm:$0xff] %v231_v27 }
 0x216   :  { %288 = shalt.err (!%p285_p12)
}
 0x217   :  { %s289_s6 = scalar_lea.hbm %s372_s3, 128 }
 0x218   :  { %p290_p13 = scmp.ne.s32.totalorder %s372_s3, %s289_s6  ;;  %p293_p0 = scmp.lt.u32.totalorder %s289_s6, %s372_s3 }
 0x21a   :  { %p295_p1 = pnand %p293_p0, %p290_p13 }
 0x21c   :  { %298 = shalt.err (!%p295_p1)
}
 0x21d   :  { %242 = dma.vmem_to_hbm [thread:$0]  %s240_s28, 128, %s372_s3, [#allocation4]  }
 0x21e   :  { %301 = dma.done.wait [#allocation4], 128  }
 0x21f   :  { %302 = vsyncadd [#allocation4], 4294967168 }
 0x220   :  { %246 = vsyncpa [#allocation3], 1 }
 0x221   :  { %247 = vsyncpa [#allocation4], 1 }

</bundles_post_ra>
